<compile_context>
chip_gen: v7x
topology: tpu7x:2x2x1
jax: 0.10.0
libtpu: 0.0.40
codegen_flags: <defaults>
</compile_context>

<pallas_src>
import functools

import jax
import jax.numpy as jnp
from jax.experimental import pallas as pl
from jax.experimental.pallas import tpu as pltpu

# Module constants (small, TPU-friendly versions of the original globals).
IN_CHANNELS = 4
N_FILTERS = 128   # original file uses 512; scaled down but still a multiple of 128 lanes
HOR_FILTER = 3


def _fused_conv_relu_kernel(x_ref, w_ref, o_ref, *, hor_filter, rows, width, w_out, nb):
    """NB images per grid step: fused im2col + (C_out,K)x(K,S) matmul + ReLU.

    x_ref: (NB, C_in, rows*width)     f32        flattened (H, W) spatial, NCHW order
    w_ref: (C_out, hor_filter*C_in)   bf16       column order = kw*C_in + ci
    o_ref: (NB, C_out, rows*w_out)    bf16/f32   flattened (H, W_out) -> NCHW output
    """
    s_in = rows * width
    cols = s_in - (hor_filter - 1)          # every column any tap ever needs

    for b in range(nb):                     # static unroll; nb is tiny (1 or N/2)
        x = x_ref[b].astype(jnp.bfloat16)   # (C_in, S_in); bf16 before any shuffling

        # Fused im2col, stage 1: one full-width shifted lane-slice per tap
        #   combined[kw*C_in + ci, s] = x[ci, s + kw]
        taps = [x[:, kw:kw + cols] for kw in range(hor_filter)]
        combined = taps[0] if hor_filter == 1 else jnp.concatenate(taps, axis=0)

        # Stage 2: shared per-row compaction, done ONCE for all taps
        #   rhs[kw*C_in + ci, r*w_out + w] = x[ci, r*width + w + kw]
        row_sl = [combined[:, r * width: r * width + w_out] for r in range(rows)]
        rhs = row_sl[0] if rows == 1 else jnp.concatenate(row_sl, axis=1)   # (K, rows*w_out)

        acc = jnp.dot(w_ref[...], rhs, preferred_element_type=jnp.float32)  # (C_out, rows*w_out)
        o_ref[b] = jnp.maximum(acc, 0.0).astype(o_ref.dtype)                # dense NCHW store


@functools.partial(jax.jit, static_argnames=("hor_filter", "out_dtype"))
def style_net_forward(x, weight, *, hor_filter=HOR_FILTER, out_dtype=jnp.bfloat16):
    """x: (N, C_in, H, W) float32, weight: (C_out, C_in, 1, hor_filter) float32."""
    N, C_in, H, W = x.shape
    C_out = weight.shape[0]
    assert hor_filter <= W, "hor_filter must not exceed W for a 'valid' conv"
    W_out = W - hor_filter + 1
    assert W_out >= 1
    S_in, S_out = H * W, H * W_out
    K = hor_filter * C_in

    # Batch folding: 2 equal "parallel" steps when possible (keeps both v7x TCs busy,
    # near-free on single-TC v5e/v6e); otherwise one image per step.
    num_steps = 2 if (N % 2 == 0 and N >= 2) else N
    NB = N // num_steps

    # Free (metadata-only) reshape: merge the trailing spatial dims of NCHW.
    x_flat = x.reshape(N, C_in, S_in)

    # weight (C_out, C_in, 1, hf) -> (C_out, hf*C_in), column order kw*C_in + ci to match
    # the kernel's tap-major rhs.  Tiny (C_out*K elements); cast to bf16 for the MXU.
    w2d = jnp.transpose(weight[:, :, 0, :], (0, 2, 1)).reshape(C_out, K).astype(jnp.bfloat16)

    kernel = functools.partial(
        _fused_conv_relu_kernel,
        hor_filter=hor_filter, rows=H, width=W, w_out=W_out, nb=NB)

    out_flat = pl.pallas_call(
        kernel,
        out_shape=jax.ShapeDtypeStruct((N, C_out, S_out), out_dtype),
        grid_spec=pltpu.PrefetchScalarGridSpec(
            num_scalar_prefetch=0,
            grid=(num_steps,),                                        # NB images per step
            in_specs=[
                pl.BlockSpec((NB, C_in, S_in), lambda n: (n, 0, 0)),  # NB whole images
                pl.BlockSpec((C_out, K), lambda n: (0, 0)),           # weight, resident
            ],
            out_specs=pl.BlockSpec((NB, C_out, S_out), lambda n: (n, 0, 0)),
        ),
        compiler_params=pltpu.CompilerParams(
            dimension_semantics=("parallel",),                        # batch split across TCs
        ),
    )(x_flat, w2d)

    # Free reshape: already channel-major, so this IS NCHW — no transpose pass.
    return out_flat.reshape(N, C_out, H, W_out)


def _reference(x, weight, *, bf16_operands=False):
    """Pure-JAX reference conv+relu (optionally with bf16-rounded operands)."""
    if bf16_operands:
        x = x.astype(jnp.bfloat16).astype(jnp.float32)
        weight = weight.astype(jnp.bfloat16).astype(jnp.float32)
    out = jax.lax.conv_general_dilated(
        x, weight,
        window_strides=(1, 1),
        padding="VALID",
        dimension_numbers=("NCHW", "OIHW", "NCHW"),
    )
    return jnp.maximum(out, 0.0)


if __name__ == "__main__":
    key = jax.random.PRNGKey(0)
    kx, kw = jax.random.split(key)

    # Small shapes consistent with the module's forward (NCHW input); even N so the
    # batch folds into exactly 2 parallel grid steps (one per v7x TensorCore).
    N, H, W = 4, 8, 32
    x = jax.random.normal(kx, (N, IN_CHANNELS, H, W), dtype=jnp.float32)

    # Deterministic Kaiming-uniform-like init for Conv2d weight (bias=False).
    fan_in = IN_CHANNELS * 1 * HOR_FILTER
    bound = 1.0 / jnp.sqrt(jnp.float32(fan_in))
    weight = jax.random.uniform(
        kw, (N_FILTERS, IN_CHANNELS, 1, HOR_FILTER),
        minval=-bound, maxval=bound, dtype=jnp.float32)

    W_out = W - HOR_FILTER + 1
    ref_bf16 = _reference(x, weight, bf16_operands=True)   # same products as the kernel
    ref_f32 = _reference(x, weight, bf16_operands=False)   # true f32 conv

    # Default path: bf16 output (halves the dominant HBM write traffic).
    out_bf16 = jax.block_until_ready(style_net_forward(x, weight, hor_filter=HOR_FILTER))
    assert out_bf16.shape == (N, N_FILTERS, H, W_out), out_bf16.shape
    assert out_bf16.dtype == jnp.bfloat16, out_bf16.dtype
    assert jnp.allclose(out_bf16.astype(jnp.float32), ref_bf16, atol=3e-2, rtol=3e-2), \
        "bf16-output mismatch vs bf16-operand reference"

    # f32-output path (original module's output dtype); same bf16 operands, f32 accumulation.
    out_f32 = jax.block_until_ready(
        style_net_forward(x, weight, hor_filter=HOR_FILTER, out_dtype=jnp.float32))
    assert out_f32.shape == (N, N_FILTERS, H, W_out), out_f32.shape
    assert out_f32.dtype == jnp.float32, out_f32.dtype
    # Tight check: fused im2col / layout / ReLU are exact vs. same-rounded-operand conv.
    assert jnp.allclose(out_f32, ref_bf16, atol=1e-3, rtol=1e-3), \
        "f32-output mismatch vs bf16-operand reference"
    # Loose check: bounds the bf16 operand rounding error vs. the true f32 conv.
    assert jnp.allclose(out_f32, ref_f32, atol=1e-1, rtol=5e-2), \
        "mismatch vs f32 reference conv"

    print("KERNEL_OK")
</pallas_src>

<mosaic_0001>
module attributes {stable_mosaic.version = 11 : i64} {
  func.func @_fused_conv_relu_kernel(%arg0: i32, %arg1: memref<2x4x256xf32, #tpu.memory_space<vmem>>, %arg2: memref<128x12xbf16, #tpu.memory_space<vmem>>, %arg3: memref<2x128x240xbf16, #tpu.memory_space<vmem>>) attributes {dimension_semantics = [#tpu.dimension_semantics<parallel>], iteration_bounds = array<i64: 2>, scalar_prefetch = 0 : i64, scratch_operands = 0 : i64, tpu.core_type = #tpu.core_type<tc>, window_params = [{transform_indices = @transform_0, window_bounds = array<i64: 2, 4, 256>}, {pipeline_mode = #tpu.pipeline_mode<synchronous>, transform_indices = @transform_1, window_bounds = array<i64: 128, 12>}, {transform_indices = @transform_2, window_bounds = array<i64: 2, 128, 240>}]} {
    %c0 = arith.constant 0 : index
    %c0_0 = arith.constant 0 : index
    %c0_1 = arith.constant 0 : index
    %0 = vector.load %arg1[%c0, %c0_0, %c0_1] : memref<2x4x256xf32, #tpu.memory_space<vmem>>, vector<1x4x256xf32>
    %1 = vector.shape_cast %0 : vector<1x4x256xf32> to vector<4x256xf32>
    %2 = arith.truncf %1 : vector<4x256xf32> to vector<4x256xbf16>
    %3 = vector.extract_strided_slice %2 {offsets = [0, 0], sizes = [4, 254], strides = [1, 1]} : vector<4x256xbf16> to vector<4x254xbf16>
    %4 = vector.extract_strided_slice %2 {offsets = [0, 1], sizes = [4, 254], strides = [1, 1]} : vector<4x256xbf16> to vector<4x254xbf16>
    %5 = vector.extract_strided_slice %2 {offsets = [0, 2], sizes = [4, 254], strides = [1, 1]} : vector<4x256xbf16> to vector<4x254xbf16>
    %6 = tpu.concatenate %3, %4, %5 in 0 : vector<4x254xbf16>, vector<4x254xbf16>, vector<4x254xbf16> -> vector<12x254xbf16>
    %7 = vector.extract_strided_slice %6 {offsets = [0, 0], sizes = [12, 30], strides = [1, 1]} : vector<12x254xbf16> to vector<12x30xbf16>
    %8 = vector.extract_strided_slice %6 {offsets = [0, 32], sizes = [12, 30], strides = [1, 1]} : vector<12x254xbf16> to vector<12x30xbf16>
    %9 = vector.extract_strided_slice %6 {offsets = [0, 64], sizes = [12, 30], strides = [1, 1]} : vector<12x254xbf16> to vector<12x30xbf16>
    %10 = vector.extract_strided_slice %6 {offsets = [0, 96], sizes = [12, 30], strides = [1, 1]} : vector<12x254xbf16> to vector<12x30xbf16>
    %11 = vector.extract_strided_slice %6 {offsets = [0, 128], sizes = [12, 30], strides = [1, 1]} : vector<12x254xbf16> to vector<12x30xbf16>
    %12 = vector.extract_strided_slice %6 {offsets = [0, 160], sizes = [12, 30], strides = [1, 1]} : vector<12x254xbf16> to vector<12x30xbf16>
    %13 = vector.extract_strided_slice %6 {offsets = [0, 192], sizes = [12, 30], strides = [1, 1]} : vector<12x254xbf16> to vector<12x30xbf16>
    %14 = vector.extract_strided_slice %6 {offsets = [0, 224], sizes = [12, 30], strides = [1, 1]} : vector<12x254xbf16> to vector<12x30xbf16>
    %15 = tpu.concatenate %7, %8, %9, %10, %11, %12, %13, %14 in 1 : vector<12x30xbf16>, vector<12x30xbf16>, vector<12x30xbf16>, vector<12x30xbf16>, vector<12x30xbf16>, vector<12x30xbf16>, vector<12x30xbf16>, vector<12x30xbf16> -> vector<12x240xbf16>
    %c0_2 = arith.constant 0 : index
    %c0_3 = arith.constant 0 : index
    %16 = vector.load %arg2[%c0_2, %c0_3] : memref<128x12xbf16, #tpu.memory_space<vmem>>, vector<128x12xbf16>
    %cst = arith.constant dense<0.000000e+00> : vector<128x240xf32>
    %17 = tpu.matmul %16, %15, %cst {dimension_numbers = #tpu.dot_dimension_numbers<[1], [0], [0], [1], [0, 0, 1, 1], [], []>} : vector<128x12xbf16>, vector<12x240xbf16>, vector<128x240xf32> -> vector<128x240xf32>
    %cst_4 = arith.constant 0.000000e+00 : f32
    %18 = vector.broadcast %cst_4 : f32 to vector<128x240xf32>
    %19 = arith.maximumf %17, %18 : vector<128x240xf32>
    %20 = arith.truncf %19 : vector<128x240xf32> to vector<128x240xbf16>
    %c0_5 = arith.constant 0 : index
    %c0_6 = arith.constant 0 : index
    %c0_7 = arith.constant 0 : index
    %21 = vector.load %arg3[%c0_5, %c0_6, %c0_7] : memref<2x128x240xbf16, #tpu.memory_space<vmem>>, vector<1x128x240xbf16>
    %22 = vector.shape_cast %21 : vector<1x128x240xbf16> to vector<128x240xbf16>
    %23 = vector.shape_cast %20 : vector<128x240xbf16> to vector<1x128x240xbf16>
    tpu.vector_store %arg3[%c0_5, %c0_6, %c0_7], %23 {strides = array<i32>} : memref<2x128x240xbf16, #tpu.memory_space<vmem>>, vector<1x128x240xbf16>,
    %c1 = arith.constant 1 : index
    %c0_8 = arith.constant 0 : index
    %c0_9 = arith.constant 0 : index
    %24 = vector.load %arg1[%c1, %c0_8, %c0_9] : memref<2x4x256xf32, #tpu.memory_space<vmem>>, vector<1x4x256xf32>
    %25 = vector.shape_cast %24 : vector<1x4x256xf32> to vector<4x256xf32>
    %26 = arith.truncf %25 : vector<4x256xf32> to vector<4x256xbf16>
    %27 = vector.extract_strided_slice %26 {offsets = [0, 0], sizes = [4, 254], strides = [1, 1]} : vector<4x256xbf16> to vector<4x254xbf16>
    %28 = vector.extract_strided_slice %26 {offsets = [0, 1], sizes = [4, 254], strides = [1, 1]} : vector<4x256xbf16> to vector<4x254xbf16>
    %29 = vector.extract_strided_slice %26 {offsets = [0, 2], sizes = [4, 254], strides = [1, 1]} : vector<4x256xbf16> to vector<4x254xbf16>
    %30 = tpu.concatenate %27, %28, %29 in 0 : vector<4x254xbf16>, vector<4x254xbf16>, vector<4x254xbf16> -> vector<12x254xbf16>
    %31 = vector.extract_strided_slice %30 {offsets = [0, 0], sizes = [12, 30], strides = [1, 1]} : vector<12x254xbf16> to vector<12x30xbf16>
    %32 = vector.extract_strided_slice %30 {offsets = [0, 32], sizes = [12, 30], strides = [1, 1]} : vector<12x254xbf16> to vector<12x30xbf16>
    %33 = vector.extract_strided_slice %30 {offsets = [0, 64], sizes = [12, 30], strides = [1, 1]} : vector<12x254xbf16> to vector<12x30xbf16>
    %34 = vector.extract_strided_slice %30 {offsets = [0, 96], sizes = [12, 30], strides = [1, 1]} : vector<12x254xbf16> to vector<12x30xbf16>
    %35 = vector.extract_strided_slice %30 {offsets = [0, 128], sizes = [12, 30], strides = [1, 1]} : vector<12x254xbf16> to vector<12x30xbf16>
    %36 = vector.extract_strided_slice %30 {offsets = [0, 160], sizes = [12, 30], strides = [1, 1]} : vector<12x254xbf16> to vector<12x30xbf16>
    %37 = vector.extract_strided_slice %30 {offsets = [0, 192], sizes = [12, 30], strides = [1, 1]} : vector<12x254xbf16> to vector<12x30xbf16>
    %38 = vector.extract_strided_slice %30 {offsets = [0, 224], sizes = [12, 30], strides = [1, 1]} : vector<12x254xbf16> to vector<12x30xbf16>
    %39 = tpu.concatenate %31, %32, %33, %34, %35, %36, %37, %38 in 1 : vector<12x30xbf16>, vector<12x30xbf16>, vector<12x30xbf16>, vector<12x30xbf16>, vector<12x30xbf16>, vector<12x30xbf16>, vector<12x30xbf16>, vector<12x30xbf16> -> vector<12x240xbf16>
    %c0_10 = arith.constant 0 : index
    %c0_11 = arith.constant 0 : index
    %40 = vector.load %arg2[%c0_10, %c0_11] : memref<128x12xbf16, #tpu.memory_space<vmem>>, vector<128x12xbf16>
    %cst_12 = arith.constant dense<0.000000e+00> : vector<128x240xf32>
    %41 = tpu.matmul %40, %39, %cst_12 {dimension_numbers = #tpu.dot_dimension_numbers<[1], [0], [0], [1], [0, 0, 1, 1], [], []>} : vector<128x12xbf16>, vector<12x240xbf16>, vector<128x240xf32> -> vector<128x240xf32>
    %cst_13 = arith.constant 0.000000e+00 : f32
    %42 = vector.broadcast %cst_13 : f32 to vector<128x240xf32>
    %43 = arith.maximumf %41, %42 : vector<128x240xf32>
    %44 = arith.truncf %43 : vector<128x240xf32> to vector<128x240xbf16>
    %c1_14 = arith.constant 1 : index
    %c0_15 = arith.constant 0 : index
    %c0_16 = arith.constant 0 : index
    %45 = vector.load %arg3[%c1_14, %c0_15, %c0_16] : memref<2x128x240xbf16, #tpu.memory_space<vmem>>, vector<1x128x240xbf16>
    %46 = vector.shape_cast %45 : vector<1x128x240xbf16> to vector<128x240xbf16>
    %47 = vector.shape_cast %44 : vector<128x240xbf16> to vector<1x128x240xbf16>
    tpu.vector_store %arg3[%c1_14, %c0_15, %c0_16], %47 {strides = array<i32>} : memref<2x128x240xbf16, #tpu.memory_space<vmem>>, vector<1x128x240xbf16>,
    return
  }
  func.func @transform_0(%arg0: i32) -> (i32, i32, i32) {
    %c0_i32 = arith.constant 0 : i32
    %c0_i32_0 = arith.constant 0 : i32
    %c0_i32_1 = arith.constant 0 : i32
    return %arg0, %c0_i32, %c0_i32_0 : i32, i32, i32
  }
  func.func @transform_1(%arg0: i32) -> (i32, i32) {
    %c0_i32 = arith.constant 0 : i32
    %c0_i32_0 = arith.constant 0 : i32
    %c0_i32_1 = arith.constant 0 : i32
    return %c0_i32, %c0_i32_0 : i32, i32
  }
  func.func @transform_2(%arg0: i32) -> (i32, i32, i32) {
    %c0_i32 = arith.constant 0 : i32
    %c0_i32_0 = arith.constant 0 : i32
    %c0_i32_1 = arith.constant 0 : i32
    return %arg0, %c0_i32, %c0_i32_0 : i32, i32, i32
  }
}

</mosaic_0001>

<bundles_post_ra>
// kernel: style_net_forward.1
= control target key start
LH: loop header
LB: loop body
LE: loop exit
PB: predicated region body
PF: predicated region fallthrough
CT: control target
= control target key end

     0   :  { %s1231_s9 = smov 0   ;;  %s1463_s0 = inlined_call_operand.vmem [shape: f32[4,4,256], index: 0, kind: input, shape index: {}]   ;;  %s1464_s1 = inlined_call_operand.vmem [shape: bf16[128,12], index: 1, kind: input, shape index: {}]   ;;  %s1465_s2 = inlined_call_operand.vmem [shape: bf16[4,128,240], index: 2, kind: output, shape index: {}]  }
   0x1 LB: > { %s1034_s10 = sadd.s32 4294967295, %s1205_s9   ;;  %p1038_p0 = scmp.ge.s32.totalorder %s1205_s9, 1  ;;  %s1205_s9 = sphi %s1231_s9, %s12_s9  }
   0x2   : > { %p114_p1 = scmp.lt.s32.totalorder %s1205_s9, 3 }
   0x4   : > { %p115_p2 = pnand %p1038_p0, %p114_p1 }
   0x5   : > { %s1039_s11 = sshll.u32 (!%p115_p2), %s1034_s10, 1  ;;  %s1207_s16 = smov (!%p115_p2), 126   ;;  %vm177_vm0 = vcmask (!%p115_p2), 1041408   ;;  %vm184_vm1 = vcmask (!%p115_p2), 1043456   ;;  %vm167_vm2 = vcmask (!%p115_p2), 1039360   ;;  %vm175_vm3 = vcmask (!%p115_p2), 1031168  }
   0x6   : > { %118 = sbr.rel (%p115_p2) target bundleno = 567 (0x237), region = 28  ;;  %p139_p3 = scmp.lt.s32.totalorder (!%p115_p2), %s1039_s11, 3  ;;  %v1215_v34 = vmov (!%p115_p2), 0   ;;  %vm217_vm4 = vcmask (!%p115_p2), 179200   ;;  %vm220_vm5 = vcmask (!%p115_p2), 424960   ;;  %vm223_vm6 = vcmask (!%p115_p2), 670720  }
   0x7   : > { %s1208_s17 = smov (!%p115_p2), 127   ;;  %s1209_s18 = smov (!%p115_p2), 118   ;;  %344 = vmatprep.mubr.bf16.mxu0 (!%p115_p2), %v1215_v34  ;;  %750 = vmatprep.mubr.bf16.mxu1 (!%p115_p2), %v1215_v34  ;;  %vm307_vm7 = vcmask (!%p115_p2), 1045504   ;;  %vm205_vm8 = vcmask (!%p115_p2), 244736   ;;  %vm208_vm9 = vcmask (!%p115_p2), 490496   ;;  %vm211_vm10 = vcmask (!%p115_p2), 736256  }
   0x8   : > { %s1210_s19 = smov (!%p115_p2), 120   ;;  %s1211_s20 = smov (!%p115_p2), 116   ;;  %vm214_vm11 = vcmask (!%p115_p2), 982016   ;;  %v1183_v58 = vld [vmem:[%s1464_s1] sm:$0xff] (!%p115_p2)   ;;  %vm282_vm12 = vcmask (!%p115_p2), 97280   ;;  %vm553_vm13 = vcmask (!%p115_p2), 916484  }
   0x9   : > { %s1212_s21 = smov (!%p115_p2), 124   ;;  %s1213_s22 = smov (!%p115_p2), 114   ;;  %vm1360_vm14 = vmor (!%p115_p2), %vm553_vm13, %vm184_vm1 }
   0xa   : > { %s1214_s23 = smov (!%p115_p2), 122  }
   0xd   : > { %s1469_s11 = smov (!%p139_p3, %s1039_s11), 3 }
   0xe   : > { %s1130_s12 = sshll.u32 %s1469_s11, 3  ;;  %s1131_s30 = sshll.u32 %s1469_s11, 7 }
   0xf   : > { %s143_s15 = scalar_lea.vmem %s1463_s0, %s1130_s12  ;;  %s1357_s5 = scalar_lea.vmem %s1465_s2, %s1131_s30 }
  0x10   : > { %v153_v0 = vld [vmem:[%s143_s15] sm:$0xff]  ;;  %v1078_v1 = vld [vmem:[%s143_s15 + $0x8] sm:$0xff] }
  0x11   : > { %v157_v2 = vpack.c.bf16 %v153_v0, %v153_v0  ;;  %v155_v3 = vcombine.high %v153_v0, %v153_v0  ;;  %v576_v4 = vpack.c.bf16 %v1078_v1, %v1078_v1  ;;  %v574_v5 = vcombine.high %v1078_v1, %v1078_v1 }
  0x13   : > { %v169_v6 = vrot.slane %v157_v2, 4  ;;  %v161_v7 = vrot.slane %v157_v2, 6  ;;  %v158_v8 = vpack.c.bf16 %v155_v3, %v155_v3  ;;  %v580_v9 = vrot.slane %v576_v4, 6 }
  0x14   : > { %v577_v11 = vpack.c.bf16 %v574_v5, %v574_v5  ;;  %v587_v15 = vrot.slane %v576_v4, 4  ;;  %v1185_v5 = vld [vmem:[%s1464_s1 + $0x8] sm:$0xff]  }
  0x15   : > { %171 = vrot.lane.b32.xlu1 %v169_v6, %s1207_s16  ;;  %163 = vrot.lane.b32.xlu0 %v161_v7, %s1208_s17  ;;  %v170_v10 = vrot.slane %v158_v8, 4  ;;  %v162_v13 = vrot.slane %v158_v8, 6  ;;  %v1186_v6 = vld [vmem:[%s1464_s1 + $0x8] sm:$0xff]   ;;  %v1187_v7 = vld [vmem:[%s1464_s1 + $0x10] sm:$0xff]  }
  0x16   : > { %v581_v12 = vrot.slane %v577_v11, 6  ;;  %v588_v14 = vrot.slane %v577_v11, 4 }
  0x19   : > { %582 = vrot.lane.b32.xlu0 %v580_v9, %s1208_s17  ;;  %173 = vrot.lane.b32.xlu1 %v170_v10, %s1207_s16  ;;  %v1189_v9 = vld [vmem:[%s1464_s1 + $0x18] sm:$0xff]  }
  0x1a   : > { %v1190_v10 = vld [vmem:[%s1464_s1 + $0x18] sm:$0xff]  }
  0x1d   : > { %584 = vrot.lane.b32.xlu1 %v581_v12, %s1208_s17  ;;  %165 = vrot.lane.b32.xlu0 %v162_v13, %s1208_s17  ;;  %v1192_v12 = vld [vmem:[%s1464_s1 + $0x20] sm:$0xff]   ;;  %v1193_v13 = vld [vmem:[%s1464_s1 + $0x28] sm:$0xff]  }
  0x21   : > { %591 = vrot.lane.b32.xlu1 %v588_v14, %s1207_s16  ;;  %589 = vrot.lane.b32.xlu0 %v587_v15, %s1207_s16  ;;  %v1194_v14 = vld [vmem:[%s1464_s1 + $0x28] sm:$0xff]   ;;  %v1195_v15 = vld [vmem:[%s1464_s1 + $0x30] sm:$0xff]  }
  0x87   : > { %v172_v16 = vpop.permute.xlu1 %171  ;;  %v164_v17 = vpop.permute.xlu0 %163 }
  0x8b   : > { %v583_v18 = vpop.permute.xlu0 %582  ;;  %v174_v19 = vpop.permute.xlu1 %173 }
  0x8c   : > { %v176_v29 = vsel %vm175_vm3, %v172_v16, %v174_v19  ;;  %v1196_v16 = vld [vmem:[%s1464_s1 + $0x30] sm:$0xff]  }
  0x8f   : > { %v585_v20 = vpop.permute.xlu1 %584  ;;  %v166_v21 = vpop.permute.xlu0 %165 }
  0x90   : > { %v183_v22 = vsel %vm177_vm0, %v158_v8, %v166_v21  ;;  %v599_v23 = vsel %vm177_vm0, %v577_v11, %v585_v20  ;;  %v168_v25 = vsel %vm167_vm2, %v164_v17, %v166_v21  ;;  %v586_v32 = vsel %vm167_vm2, %v583_v18, %v585_v20  ;;  %v1188_v8 = vld [vmem:[%s1464_s1 + $0x10] sm:$0xff]   ;;  %v1191_v11 = vld [vmem:[%s1464_s1 + $0x20] sm:$0xff]   ;;  %v1197_v17 = vld [vmem:[%s1464_s1 + $0x38] sm:$0xff]  }
  0x91   : > { %v188_v24 = vsel %vm184_vm1, %v183_v22, %v174_v19  ;;  %v180_v28 = vsel %vm177_vm0, %v157_v2, %v168_v25  ;;  %v596_v35 = vsel %vm177_vm0, %v576_v4, %v586_v32  ;;  %v1184_v4 = vld [vmem:[%s1464_s1] sm:$0xff]   ;;  %v1198_v18 = vld [vmem:[%s1464_s1 + $0x38] sm:$0xff]  }
  0x92   : > { %199 = vrot.lane.b32.xlu1 %v188_v24, %s1209_s18  ;;  %197 = vrot.lane.b32.xlu0 %v188_v24, %s1210_s19  ;;  %v186_v30 = vsel %vm184_vm1, %v180_v28, %v176_v29 }
  0x93   : > { %v592_v26 = vpop.permute.xlu1 %591  ;;  %v590_v31 = vpop.permute.xlu0 %589 }
  0x94   : > { %v603_v27 = vsel %vm184_vm1, %v599_v23, %v592_v26  ;;  %v593_v33 = vsel %vm175_vm3, %v590_v31, %v592_v26 }
  0x95   : > { %v601_v36 = vsel %vm184_vm1, %v596_v35, %v593_v33 }
  0x96   : > { %614 = vrot.lane.b32.xlu1 %v603_v27, %s1209_s18  ;;  %201 = vrot.lane.b32.xlu0 %v188_v24, %s1211_s20 }
  0x9a   : > { %612 = vrot.lane.b32.xlu0 %v603_v27, %s1210_s19  ;;  %192 = vrot.lane.b32.xlu1 %v186_v30, %s1212_s21 }
  0x9e   : > { %203 = vrot.lane.b32.xlu0 %v188_v24, %s1213_s22  ;;  %194 = vrot.lane.b32.xlu1 %v186_v30, %s1214_s23 }
  0xa2   : > { %190 = vrot.lane.b32.xlu0 %v186_v30, %s1207_s16  ;;  %607 = vrot.lane.b32.xlu1 %v601_v36, %s1212_s21 }
  0xa6   : > { %609 = vrot.lane.b32.xlu1 %v601_v36, %s1214_s23  ;;  %605 = vrot.lane.b32.xlu0 %v601_v36, %s1207_s16 }
  0xaa   : > { %618 = vrot.lane.b32.xlu1 %v603_v27, %s1213_s22  ;;  %616 = vrot.lane.b32.xlu0 %v603_v27, %s1211_s20 }
 0x104   : > { %v200_v37 = vpop.permute.xlu1 %199  ;;  %v198_v38 = vpop.permute.xlu0 %197 }
 0x105   : > { %v219_v43 = vsel %vm217_vm4, %v198_v38, %v200_v37 }
 0x108   : > { %v615_v39 = vpop.permute.xlu1 %614  ;;  %v202_v40 = vpop.permute.xlu0 %201 }
 0x109   : > { %v222_v44 = vsel %vm220_vm5, %v219_v43, %v202_v40 }
 0x10c   : > { %v193_v41 = vpop.permute.xlu1 %192  ;;  %v613_v42 = vpop.permute.xlu0 %612 }
 0x10d   : > { %v629_v61 = vsel %vm217_vm4, %v613_v42, %v615_v39 }
 0x110   : > { %v195_v45 = vpop.permute.xlu1 %194  ;;  %v204_v46 = vpop.permute.xlu0 %203 }
 0x111   : > { %v225_v47 = vsel %vm223_vm6, %v222_v44, %v204_v46 }
 0x112   : > { %1053 = vmatprep.subr.msk.bf16.mxu0 %vm307_vm7, %v225_v47 }
 0x114   : > { %v608_v48 = vpop.permute.xlu1 %607  ;;  %v191_v49 = vpop.permute.xlu0 %190 }
 0x115   : > { %v207_v50 = vsel %vm205_vm8, %v186_v30, %v191_v49 }
 0x116   : > { %v210_v51 = vsel %vm208_vm9, %v207_v50, %v193_v41 }
 0x117   : > { %v213_v52 = vsel %vm211_vm10, %v210_v51, %v195_v45 }
 0x118   : > { %v610_v53 = vpop.permute.xlu1 %609  ;;  %v606_v54 = vpop.permute.xlu0 %605  ;;  %v216_v55 = vsel %vm214_vm11, %v213_v52, %v198_v38 }
 0x119   : > { %v621_v56 = vsel %vm205_vm8, %v601_v36, %v606_v54  ;;  %v308_v57 = vsel %vm307_vm7, %v216_v55, 0 }
 0x11a   : > { %v623_v59 = vsel %vm208_vm9, %v621_v56, %v608_v48  ;;  %313 = vmatpush1.bf16.msra.mxu0 %v308_v57 }
 0x11b   : > { %v625_v60 = vsel %vm211_vm10, %v623_v59, %v610_v53 }
 0x11c   : > { %v619_v62 = vpop.permute.xlu1 %618  ;;  %v617_v63 = vpop.permute.xlu0 %616  ;;  %v627_v0 = vsel %vm214_vm11, %v625_v60, %v613_v42 }
 0x11d   : > { %v631_v1 = vsel %vm220_vm5, %v629_v61, %v617_v63  ;;  %1054 = vmatmul.mubr.msk.bf16.vlgmr.msra.gmra.mrb[0].mxu0 %vm282_vm12, %v1183_v58  ;;  %v714_v3 = vsel %vm307_vm7, %v627_v0, 0 }
 0x11e   : > { %v633_v2 = vsel %vm223_vm6, %v631_v1, %v619_v62  ;;  %354 = vmatprep.mubr.bf16.mxu0 %v1215_v34 }
 0x11f   : > { %1087 = vmatprep.subr.msk.bf16.mxu1 %vm307_vm7, %v633_v2 }
 0x120   : > { %719 = vmatpush1.bf16.msra.mxu1 %v714_v3 }
 0x123   : > { %1088 = vmatmul.mubr.msk.bf16.vlgmr.msra.gmra.mrb[0].mxu1 %vm282_vm12, %v1184_v4 }
 0x124   : > { %760 = vmatprep.mubr.bf16.mxu1 %v1215_v34 }
 0x125   : > { %1055 = vmatmul.mubr.msk.bf16.gmra.mrb[4].mxu0 %vm282_vm12, %v1185_v5 }
 0x126   : > { %364 = vmatprep.mubr.bf16.mxu0 %v1215_v34 }
 0x12b   : > { %1089 = vmatmul.mubr.msk.bf16.gmra.mrb[4].mxu1 %vm282_vm12, %v1186_v6 }
 0x12c   : > { %770 = vmatprep.mubr.bf16.mxu1 %v1215_v34 }
 0x12d   : > { %1056 = vmatmul.mubr.msk.bf16.gmra.mrb[8].mxu0 %vm282_vm12, %v1187_v7 }
 0x12e   : > { %374 = vmatprep.mubr.bf16.mxu0 %v1215_v34 }
 0x133   : > { %1090 = vmatmul.mubr.msk.bf16.gmra.mrb[8].mxu1 %vm282_vm12, %v1188_v8 }
 0x134   : > { %780 = vmatprep.mubr.bf16.mxu1 %v1215_v34 }
 0x135   : > { %1057 = vmatmul.mubr.msk.bf16.gmra.mrb[12].mxu0 %vm282_vm12, %v1189_v9 }
 0x136   : > { %384 = vmatprep.mubr.bf16.mxu0 %v1215_v34 }
 0x13b   : > { %1091 = vmatmul.mubr.msk.bf16.gmra.mrb[12].mxu1 %vm282_vm12, %v1190_v10 }
 0x13c   : > { %790 = vmatprep.mubr.bf16.mxu1 %v1215_v34 }
 0x13d   : > { %1058 = vmatmul.mubr.msk.bf16.gmra.mrb[16].mxu0 %vm282_vm12, %v1191_v11 }
 0x13e   : > { %394 = vmatprep.mubr.bf16.mxu0 %v1215_v34 }
 0x143   : > { %1092 = vmatmul.mubr.msk.bf16.gmra.mrb[16].mxu1 %vm282_vm12, %v1192_v12 }
 0x144   : > { %800 = vmatprep.mubr.bf16.mxu1 %v1215_v34 }
 0x145   : > { %1059 = vmatmul.mubr.msk.bf16.gmra.mrb[20].mxu0 %vm282_vm12, %v1193_v13 }
 0x146   : > { %404 = vmatprep.mubr.bf16.mxu0 %v1215_v34 }
 0x14b   : > { %1093 = vmatmul.mubr.msk.bf16.gmra.mrb[20].mxu1 %vm282_vm12, %v1194_v14 }
 0x14c   : > { %810 = vmatprep.mubr.bf16.mxu1 %v1215_v34 }
 0x14d   : > { %1060 = vmatmul.mubr.msk.bf16.gmra.mrb[24].mxu0 %vm282_vm12, %v1195_v15 }
 0x14e   : > { %414 = vmatprep.mubr.bf16.mxu0 %v1215_v34 }
 0x153   : > { %1094 = vmatmul.mubr.msk.bf16.gmra.mrb[24].mxu1 %vm282_vm12, %v1196_v16 }
 0x154   : > { %820 = vmatprep.mubr.bf16.mxu1 %v1215_v34 }
 0x155   : > { %1061 = vmatmul.mubr.msk.bf16.gmra.mrb[28].mxu0 %vm282_vm12, %v1197_v17 }
 0x15b   : > { %1095 = vmatmul.mubr.msk.bf16.gmra.mrb[28].mxu1 %vm282_vm12, %v1198_v18 }
 0x1f0   : > { %v346_v19 = vpop.f32.mrb[0].mxu0 }
 0x1f1   : > { %v425_v20 = vmax.f32 %v346_v19, 0.0  ;;  %v348_v21 = vpop.f32.mrb[1].mxu0 }
 0x1f2   : > { %v426_v22 = vmax.f32 %v348_v21, 0.0  ;;  %v350_v23 = vpop.f32.mrb[2].mxu0 }
 0x1f3   : > { %v427_v25 = vmax.f32 %v350_v23, 0.0  ;;  %v352_v26 = vpop.f32.mrb[3].mxu0 }
 0x1f4   : > { %v1132_v27 = vpack.c.bf16 %v426_v22, %v425_v20  ;;  %v428_v28 = vmax.f32 %v352_v26, 0.0 }
 0x1f6   : > { %555 = vst.msk [vmem:[%s1357_s5] sm:$0xff] %vm1360_vm14, %v1132_v27  ;;  %v1133_v29 = vpack.c.bf16 %v428_v28, %v427_v25  ;;  %v752_v30 = vpop.f32.mrb[0].mxu1 }
 0x1f7   : > { %v831_v31 = vmax.f32 %v752_v30, 0.0  ;;  %v754_v32 = vpop.f32.mrb[1].mxu1 }
 0x1f8   : > { %556 = vst.msk [vmem:[%s1357_s5 + $0x8] sm:$0xff] %vm1360_vm14, %v1133_v29  ;;  %v832_v33 = vmax.f32 %v754_v32, 0.0  ;;  %v756_v34 = vpop.f32.mrb[2].mxu1  ;;  %v356_v35 = vpop.f32.mrb[4].mxu0 }
 0x1f9   : > { %v833_v36 = vmax.f32 %v756_v34, 0.0  ;;  %v758_v37 = vpop.f32.mrb[3].mxu1  ;;  %v429_v38 = vmax.f32 %v356_v35, 0.0  ;;  %v358_v39 = vpop.f32.mrb[5].mxu0 }
 0x1fa   : > { %v1148_v40 = vpack.c.bf16 %v832_v33, %v831_v31  ;;  %v834_v41 = vmax.f32 %v758_v37, 0.0  ;;  %v430_v42 = vmax.f32 %v358_v39, 0.0  ;;  %v360_v43 = vpop.f32.mrb[6].mxu0 }
 0x1fb   : > { %v431_v44 = vmax.f32 %v360_v43, 0.0  ;;  %v362_v45 = vpop.f32.mrb[7].mxu0 }
 0x1fc   : > { %1112 = vst.msk [vmem:[%s1357_s5 + $0x80] sm:$0xff] %vm1360_vm14, %v1148_v40  ;;  %v1149_v46 = vpack.c.bf16 %v834_v41, %v833_v36  ;;  %v1134_v47 = vpack.c.bf16 %v430_v42, %v429_v38  ;;  %v432_v48 = vmax.f32 %v362_v45, 0.0 }
 0x1fe   : > { %1113 = vst.msk [vmem:[%s1357_s5 + $0x88] sm:$0xff] %vm1360_vm14, %v1149_v46  ;;  %557 = vst.msk [vmem:[%s1357_s5 + $0x10] sm:$0xff] %vm1360_vm14, %v1134_v47  ;;  %v1135_v49 = vpack.c.bf16 %v432_v48, %v431_v44  ;;  %v762_v50 = vpop.f32.mrb[4].mxu1 }
 0x1ff   : > { %v835_v51 = vmax.f32 %v762_v50, 0.0  ;;  %v764_v52 = vpop.f32.mrb[5].mxu1 }
 0x200   : > { %558 = vst.msk [vmem:[%s1357_s5 + $0x18] sm:$0xff] %vm1360_vm14, %v1135_v49  ;;  %v836_v53 = vmax.f32 %v764_v52, 0.0  ;;  %v766_v54 = vpop.f32.mrb[6].mxu1  ;;  %v366_v55 = vpop.f32.mrb[8].mxu0 }
 0x201   : > { %v837_v56 = vmax.f32 %v766_v54, 0.0  ;;  %v768_v57 = vpop.f32.mrb[7].mxu1  ;;  %v433_v58 = vmax.f32 %v366_v55, 0.0  ;;  %v368_v59 = vpop.f32.mrb[9].mxu0 }
 0x202   : > { %v1150_v60 = vpack.c.bf16 %v836_v53, %v835_v51  ;;  %v838_v61 = vmax.f32 %v768_v57, 0.0  ;;  %v434_v62 = vmax.f32 %v368_v59, 0.0  ;;  %v370_v63 = vpop.f32.mrb[10].mxu0 }
 0x203   : > { %v435_v0 = vmax.f32 %v370_v63, 0.0  ;;  %v372_v1 = vpop.f32.mrb[11].mxu0 }
 0x204   : > { %1114 = vst.msk [vmem:[%s1357_s5 + $0x90] sm:$0xff] %vm1360_vm14, %v1150_v60  ;;  %v1151_v2 = vpack.c.bf16 %v838_v61, %v837_v56  ;;  %v1136_v3 = vpack.c.bf16 %v434_v62, %v433_v58  ;;  %v436_v4 = vmax.f32 %v372_v1, 0.0 }
 0x206   : > { %1115 = vst.msk [vmem:[%s1357_s5 + $0x98] sm:$0xff] %vm1360_vm14, %v1151_v2  ;;  %559 = vst.msk [vmem:[%s1357_s5 + $0x20] sm:$0xff] %vm1360_vm14, %v1136_v3  ;;  %v1137_v5 = vpack.c.bf16 %v436_v4, %v435_v0  ;;  %v772_v6 = vpop.f32.mrb[8].mxu1 }
 0x207   : > { %v839_v7 = vmax.f32 %v772_v6, 0.0  ;;  %v774_v8 = vpop.f32.mrb[9].mxu1 }
 0x208   : > { %560 = vst.msk [vmem:[%s1357_s5 + $0x28] sm:$0xff] %vm1360_vm14, %v1137_v5  ;;  %v840_v9 = vmax.f32 %v774_v8, 0.0  ;;  %v776_v10 = vpop.f32.mrb[10].mxu1  ;;  %v376_v11 = vpop.f32.mrb[12].mxu0 }
 0x209   : > { %v841_v12 = vmax.f32 %v776_v10, 0.0  ;;  %v778_v13 = vpop.f32.mrb[11].mxu1  ;;  %v437_v14 = vmax.f32 %v376_v11, 0.0  ;;  %v378_v15 = vpop.f32.mrb[13].mxu0 }
 0x20a   : > { %v1152_v16 = vpack.c.bf16 %v840_v9, %v839_v7  ;;  %v842_v17 = vmax.f32 %v778_v13, 0.0  ;;  %v438_v18 = vmax.f32 %v378_v15, 0.0  ;;  %v380_v19 = vpop.f32.mrb[14].mxu0 }
 0x20b   : > { %v439_v20 = vmax.f32 %v380_v19, 0.0  ;;  %v382_v21 = vpop.f32.mrb[15].mxu0 }
 0x20c   : > { %1116 = vst.msk [vmem:[%s1357_s5 + $0xa0] sm:$0xff] %vm1360_vm14, %v1152_v16  ;;  %v1153_v22 = vpack.c.bf16 %v842_v17, %v841_v12  ;;  %v1138_v23 = vpack.c.bf16 %v438_v18, %v437_v14  ;;  %v440_v25 = vmax.f32 %v382_v21, 0.0 }
 0x20e   : > { %1117 = vst.msk [vmem:[%s1357_s5 + $0xa8] sm:$0xff] %vm1360_vm14, %v1153_v22  ;;  %561 = vst.msk [vmem:[%s1357_s5 + $0x30] sm:$0xff] %vm1360_vm14, %v1138_v23  ;;  %v1139_v26 = vpack.c.bf16 %v440_v25, %v439_v20  ;;  %v782_v27 = vpop.f32.mrb[12].mxu1 }
 0x20f   : > { %v843_v28 = vmax.f32 %v782_v27, 0.0  ;;  %v784_v29 = vpop.f32.mrb[13].mxu1 }
 0x210   : > { %562 = vst.msk [vmem:[%s1357_s5 + $0x38] sm:$0xff] %vm1360_vm14, %v1139_v26  ;;  %v844_v30 = vmax.f32 %v784_v29, 0.0  ;;  %v786_v31 = vpop.f32.mrb[14].mxu1  ;;  %v386_v32 = vpop.f32.mrb[16].mxu0 }
 0x211   : > { %v845_v33 = vmax.f32 %v786_v31, 0.0  ;;  %v788_v34 = vpop.f32.mrb[15].mxu1  ;;  %v441_v35 = vmax.f32 %v386_v32, 0.0  ;;  %v388_v36 = vpop.f32.mrb[17].mxu0 }
 0x212   : > { %v1154_v37 = vpack.c.bf16 %v844_v30, %v843_v28  ;;  %v846_v38 = vmax.f32 %v788_v34, 0.0  ;;  %v442_v39 = vmax.f32 %v388_v36, 0.0  ;;  %v390_v40 = vpop.f32.mrb[18].mxu0 }
 0x213   : > { %v443_v41 = vmax.f32 %v390_v40, 0.0  ;;  %v392_v42 = vpop.f32.mrb[19].mxu0 }
 0x214   : > { %1118 = vst.msk [vmem:[%s1357_s5 + $0xb0] sm:$0xff] %vm1360_vm14, %v1154_v37  ;;  %v1155_v43 = vpack.c.bf16 %v846_v38, %v845_v33  ;;  %v1140_v44 = vpack.c.bf16 %v442_v39, %v441_v35  ;;  %v444_v45 = vmax.f32 %v392_v42, 0.0 }
 0x216   : > { %1119 = vst.msk [vmem:[%s1357_s5 + $0xb8] sm:$0xff] %vm1360_vm14, %v1155_v43  ;;  %563 = vst.msk [vmem:[%s1357_s5 + $0x40] sm:$0xff] %vm1360_vm14, %v1140_v44  ;;  %v1141_v46 = vpack.c.bf16 %v444_v45, %v443_v41  ;;  %v792_v47 = vpop.f32.mrb[16].mxu1 }
 0x217   : > { %v847_v48 = vmax.f32 %v792_v47, 0.0  ;;  %v794_v49 = vpop.f32.mrb[17].mxu1 }
 0x218   : > { %564 = vst.msk [vmem:[%s1357_s5 + $0x48] sm:$0xff] %vm1360_vm14, %v1141_v46  ;;  %v848_v50 = vmax.f32 %v794_v49, 0.0  ;;  %v796_v51 = vpop.f32.mrb[18].mxu1  ;;  %v396_v52 = vpop.f32.mrb[20].mxu0 }
 0x219   : > { %v849_v53 = vmax.f32 %v796_v51, 0.0  ;;  %v798_v54 = vpop.f32.mrb[19].mxu1  ;;  %v445_v55 = vmax.f32 %v396_v52, 0.0  ;;  %v398_v56 = vpop.f32.mrb[21].mxu0 }
 0x21a   : > { %v1156_v57 = vpack.c.bf16 %v848_v50, %v847_v48  ;;  %v850_v58 = vmax.f32 %v798_v54, 0.0  ;;  %v446_v59 = vmax.f32 %v398_v56, 0.0  ;;  %v400_v60 = vpop.f32.mrb[22].mxu0 }
 0x21b   : > { %v447_v61 = vmax.f32 %v400_v60, 0.0  ;;  %v402_v62 = vpop.f32.mrb[23].mxu0 }
 0x21c   : > { %1120 = vst.msk [vmem:[%s1357_s5 + $0xc0] sm:$0xff] %vm1360_vm14, %v1156_v57  ;;  %v1157_v63 = vpack.c.bf16 %v850_v58, %v849_v53  ;;  %v1142_v0 = vpack.c.bf16 %v446_v59, %v445_v55  ;;  %v448_v1 = vmax.f32 %v402_v62, 0.0 }
 0x21e   : > { %1121 = vst.msk [vmem:[%s1357_s5 + $0xc8] sm:$0xff] %vm1360_vm14, %v1157_v63  ;;  %565 = vst.msk [vmem:[%s1357_s5 + $0x50] sm:$0xff] %vm1360_vm14, %v1142_v0  ;;  %v1143_v2 = vpack.c.bf16 %v448_v1, %v447_v61  ;;  %v802_v3 = vpop.f32.mrb[20].mxu1 }
 0x21f   : > { %v851_v4 = vmax.f32 %v802_v3, 0.0  ;;  %v804_v5 = vpop.f32.mrb[21].mxu1 }
 0x220   : > { %566 = vst.msk [vmem:[%s1357_s5 + $0x58] sm:$0xff] %vm1360_vm14, %v1143_v2  ;;  %v852_v6 = vmax.f32 %v804_v5, 0.0  ;;  %v806_v7 = vpop.f32.mrb[22].mxu1  ;;  %v406_v8 = vpop.f32.mrb[24].mxu0 }
 0x221   : > { %v853_v9 = vmax.f32 %v806_v7, 0.0  ;;  %v808_v10 = vpop.f32.mrb[23].mxu1  ;;  %v449_v11 = vmax.f32 %v406_v8, 0.0  ;;  %v408_v12 = vpop.f32.mrb[25].mxu0 }
 0x222   : > { %v1158_v13 = vpack.c.bf16 %v852_v6, %v851_v4  ;;  %v854_v14 = vmax.f32 %v808_v10, 0.0  ;;  %v450_v15 = vmax.f32 %v408_v12, 0.0  ;;  %v410_v16 = vpop.f32.mrb[26].mxu0 }
 0x223   : > { %v451_v17 = vmax.f32 %v410_v16, 0.0  ;;  %v412_v18 = vpop.f32.mrb[27].mxu0 }
 0x224   : > { %1122 = vst.msk [vmem:[%s1357_s5 + $0xd0] sm:$0xff] %vm1360_vm14, %v1158_v13  ;;  %v1159_v19 = vpack.c.bf16 %v854_v14, %v853_v9  ;;  %v1144_v20 = vpack.c.bf16 %v450_v15, %v449_v11  ;;  %v452_v21 = vmax.f32 %v412_v18, 0.0 }
 0x226   : > { %1123 = vst.msk [vmem:[%s1357_s5 + $0xd8] sm:$0xff] %vm1360_vm14, %v1159_v19  ;;  %567 = vst.msk [vmem:[%s1357_s5 + $0x60] sm:$0xff] %vm1360_vm14, %v1144_v20  ;;  %v1145_v22 = vpack.c.bf16 %v452_v21, %v451_v17  ;;  %v812_v23 = vpop.f32.mrb[24].mxu1 }
 0x227   : > { %v855_v25 = vmax.f32 %v812_v23, 0.0  ;;  %v814_v26 = vpop.f32.mrb[25].mxu1 }
 0x228   : > { %568 = vst.msk [vmem:[%s1357_s5 + $0x68] sm:$0xff] %vm1360_vm14, %v1145_v22  ;;  %v856_v27 = vmax.f32 %v814_v26, 0.0  ;;  %v816_v28 = vpop.f32.mrb[26].mxu1  ;;  %v416_v29 = vpop.f32.mrb[28].mxu0 }
 0x229   : > { %v857_v30 = vmax.f32 %v816_v28, 0.0  ;;  %v818_v31 = vpop.f32.mrb[27].mxu1  ;;  %v453_v32 = vmax.f32 %v416_v29, 0.0  ;;  %v418_v33 = vpop.f32.mrb[29].mxu0 }
 0x22a   : > { %v1160_v34 = vpack.c.bf16 %v856_v27, %v855_v25  ;;  %v858_v35 = vmax.f32 %v818_v31, 0.0  ;;  %v454_v36 = vmax.f32 %v418_v33, 0.0  ;;  %v420_v37 = vpop.f32.mrb[30].mxu0 }
 0x22b   : > { %v455_v38 = vmax.f32 %v420_v37, 0.0  ;;  %v422_v39 = vpop.f32.mrb[31].mxu0 }
 0x22c   : > { %1124 = vst.msk [vmem:[%s1357_s5 + $0xe0] sm:$0xff] %vm1360_vm14, %v1160_v34  ;;  %v1161_v40 = vpack.c.bf16 %v858_v35, %v857_v30  ;;  %v1146_v41 = vpack.c.bf16 %v454_v36, %v453_v32  ;;  %v456_v42 = vmax.f32 %v422_v39, 0.0 }
 0x22e   : > { %1125 = vst.msk [vmem:[%s1357_s5 + $0xe8] sm:$0xff] %vm1360_vm14, %v1161_v40  ;;  %569 = vst.msk [vmem:[%s1357_s5 + $0x70] sm:$0xff] %vm1360_vm14, %v1146_v41  ;;  %v1147_v43 = vpack.c.bf16 %v456_v42, %v455_v38  ;;  %v822_v44 = vpop.f32.mrb[28].mxu1 }
 0x22f   : > { %v859_v45 = vmax.f32 %v822_v44, 0.0  ;;  %v824_v46 = vpop.f32.mrb[29].mxu1 }
 0x230   : > { %570 = vst.msk [vmem:[%s1357_s5 + $0x78] sm:$0xff] %vm1360_vm14, %v1147_v43  ;;  %v860_v47 = vmax.f32 %v824_v46, 0.0  ;;  %v826_v48 = vpop.f32.mrb[30].mxu1 }
 0x231   : > { %v861_v49 = vmax.f32 %v826_v48, 0.0  ;;  %v828_v50 = vpop.f32.mrb[31].mxu1 }
 0x232   : > { %v1162_v51 = vpack.c.bf16 %v860_v47, %v859_v45  ;;  %v862_v52 = vmax.f32 %v828_v50, 0.0 }
 0x234   : > { %1126 = vst.msk [vmem:[%s1357_s5 + $0xf0] sm:$0xff] %vm1360_vm14, %v1162_v51  ;;  %v1163_v53 = vpack.c.bf16 %v862_v52, %v861_v49 }
 0x236   : > { %1127 = vst.msk [vmem:[%s1357_s5 + $0xf8] sm:$0xff] %vm1360_vm14, %v1163_v53 }
 0x237 PF: > { %s12_s9 = sadd.s32 1, %s1205_s9  }
 0x238   : > { %p9_p4 = scmp.ge.s32.totalorder %s12_s9, 4  }
 0x23a   :  { %11 = sbr.rel (!%p9_p4) target bundleno = 1 (0x1), region = 60 }

</bundles_post_ra>
